<compile_context>
chip_gen: v5e
topology: v5e:2x2
jax: 0.10.0
libtpu: 0.0.40
codegen_flags: <defaults>
</compile_context>

<pallas_src>
from functools import partial

import jax
import jax.numpy as jnp
import numpy as np
from jax.experimental import pallas as pl
from jax.experimental.pallas import tpu as pltpu


def _round_up(x, m):
    return (x + m - 1) // m * m


def _block_kernel(apply_in_bn, residual, need_mask, tb, n_valid, inv_n, *refs):
    """One hidden block: [x*scale+shift] -> Linear(+resid) -> ReLU, plus
    accumulation of this block's batch sum / sum-of-squares for its BatchNorm.

    refs (inputs then outputs):
      x_ref      (TB, Din_p)  f32/bf16  activation tile (pre-BN out of prev blk)
      [bn_in_ref (8, Din_p)   f32       row0 = scale, row1 = shift of prev BN]
      w_ref      (Din_p, H_p) bf16      weight, (in, out) layout
      vec_ref    (8, H_p)     f32       row0 = bias, row1 = gamma, row2 = beta
      h_ref      (TB, H_p)    bf16      pre-BN output activation tile
      bn_ref     (8, H_p)     f32       rows 0/1: running sum / sumsq while
                                        iterating, converted to (scale, shift)
                                        at the last tile
    """
    if apply_in_bn:
        x_ref, bn_in_ref, w_ref, vec_ref, h_ref, bn_ref = refs
    else:
        x_ref, w_ref, vec_ref, h_ref, bn_ref = refs
        bn_in_ref = None

    t = pl.program_id(0)

    x = x_ref[...].astype(jnp.float32)
    if apply_in_bn:
        x = x * bn_in_ref[0:1, :] + bn_in_ref[1:2, :]

    # bf16 operands into the MXU, f32 accumulation.
    z = jnp.dot(x.astype(jnp.bfloat16), w_ref[...],
                preferred_element_type=jnp.float32) + vec_ref[0:1, :]
    if residual:
        z = z + x
    h = jnp.maximum(z, 0.0)  # ReLU

    # Store the activation in bf16 (halves inter-layer HBM traffic).  The BN
    # statistics are computed on the rounded (stored) values so the consumer's
    # normalization is consistent with these statistics.
    hb = h.astype(h_ref.dtype)
    h_ref[...] = hb
    h32 = hb.astype(jnp.float32)

    # One-pass (sum, sum-of-squares) statistics; mask out padded batch rows.
    if need_mask:
        row = t * tb + jax.lax.broadcasted_iota(jnp.int32, (tb, 1), 0)
        hm = jnp.where(row < n_valid, h32, 0.0)
    else:
        hm = h32
    s1 = jnp.sum(hm, axis=0, keepdims=True)
    s2 = jnp.sum(hm * hm, axis=0, keepdims=True)

    @pl.when(t == 0)
    def _():
        bn_ref[...] = jnp.zeros_like(bn_ref)

    bn_ref[0:1, :] += s1
    bn_ref[1:2, :] += s2

    @pl.when(t == pl.num_programs(0) - 1)
    def _():
        gamma = vec_ref[1:2, :]
        beta = vec_ref[2:3, :]
        mu = bn_ref[0:1, :] * inv_n
        var = jnp.maximum(bn_ref[1:2, :] * inv_n - mu * mu, 0.0)  # biased var
        scale = gamma * jax.lax.rsqrt(var + 1e-5)
        bn_ref[0:1, :] = scale
        bn_ref[1:2, :] = beta - mu * scale


def _final_kernel(residual, h_ref, bn_ref, w_ref, vec_ref, out_ref):
    """Final layer: apply last block's BN (scale/shift) -> Linear (+resid)."""
    x = h_ref[...].astype(jnp.float32) * bn_ref[0:1, :] + bn_ref[1:2, :]
    z = jnp.dot(x.astype(jnp.bfloat16), w_ref[...],
                preferred_element_type=jnp.float32) + vec_ref[0:1, :]
    if residual:
        z = z + x
    out_ref[...] = z.astype(out_ref.dtype)


def resid_linear_mlp(x, block_params, final_params, *, in_dim, hidden_dim,
                     out_dim, nlayers, batch_tile=1024):
    """Forward pass of ResidLinearMLP (training-mode BatchNorm) via Pallas.

    block_params: list of (w (d_in, d_out), b, gamma, beta) for the hidden blocks.
    final_params: (w (hidden, out), b) for the output Linear.
    Weights are in (in_features, out_features) layout: x @ W + b == x @ W_pt.T + b.
    """
    assert nlayers >= 1 and len(block_params) == nlayers
    B = x.shape[0]
    f32 = jnp.float32
    bf16 = jnp.bfloat16

    in_p = _round_up(in_dim, 128)
    h_p = _round_up(hidden_dim, 128)
    o_p = _round_up(out_dim, 128)

    # Batch tile: multiple of 16 sublanes (bf16 packing), bounded by the batch.
    tb = min(_round_up(batch_tile, 16), _round_up(B, 16))
    b_p = _round_up(B, tb)
    n_tiles = b_p // tb
    need_mask = b_p != B

    resid_first = in_dim == hidden_dim
    resid_last = out_dim == hidden_dim

    def pad_weight(w, rp, cp):
        r, c = w.shape
        if (r, c) == (rp, cp):
            return w.astype(bf16)
        return (jnp.zeros((rp, cp), f32).at[:r, :c].set(w.astype(f32))
                .astype(bf16))

    def pack_vec(vals, cp):
        out = jnp.zeros((8, cp), f32)
        for i, v in enumerate(vals):
            out = out.at[i, :v.shape[0]].set(v.astype(f32))
        return out

    def vmem_limit(*bufs):
        # Double-buffer every block + slack; clamp to a v7x-safe (<64 MiB) budget.
        total = 2 * sum(int(np.prod(s)) * bpe for s, bpe in bufs)
        return int(min(max(total + (2 << 20), 16 << 20), 48 << 20))

    if b_p == B and in_p == in_dim:
        x_p = x.astype(f32)
    else:
        x_p = jnp.zeros((b_p, in_p), f32).at[:B, :in_dim].set(x.astype(f32))

    def block_call(h_in, din_p, bn_prev, w_p, vec_p, residual):
        apply_bn = bn_prev is not None
        xbytes = jnp.dtype(h_in.dtype).itemsize
        kern = partial(_block_kernel, apply_bn, residual, need_mask, tb, B, 1.0 / B)
        in_specs = [pl.BlockSpec((tb, din_p), lambda t: (t, 0))]
        args = [h_in]
        if apply_bn:
            in_specs.append(pl.BlockSpec((8, din_p), lambda t: (0, 0)))
            args.append(bn_prev)
        in_specs += [pl.BlockSpec((din_p, h_p), lambda t: (0, 0)),
                     pl.BlockSpec((8, h_p), lambda t: (0, 0))]
        args += [w_p, vec_p]
        limit = vmem_limit(((tb, din_p), xbytes), ((8, din_p), 4),
                           ((din_p, h_p), 2), ((8, h_p), 4),
                           ((tb, h_p), 2), ((8, h_p), 4))
        cost = pl.CostEstimate(
            flops=2 * b_p * din_p * h_p + 8 * b_p * h_p,
            transcendentals=h_p,
            bytes_accessed=(xbytes * b_p * din_p + 2 * b_p * h_p
                            + 2 * din_p * h_p + 4 * 16 * h_p))
        return pl.pallas_call(
            kern,
            grid=(n_tiles,),
            in_specs=in_specs,
            out_specs=(pl.BlockSpec((tb, h_p), lambda t: (t, 0)),
                       pl.BlockSpec((8, h_p), lambda t: (0, 0))),
            out_shape=(jax.ShapeDtypeStruct((b_p, h_p), bf16),
                       jax.ShapeDtypeStruct((8, h_p), f32)),
            compiler_params=pltpu.CompilerParams(
                # stats accumulate across batch tiles -> must stay sequential
                dimension_semantics=("arbitrary",),
                vmem_limit_bytes=limit),
            cost_estimate=cost,
        )(*args)

    # Hidden blocks.
    h_act = x_p
    din_p = in_p
    bn = None
    for blk, (w, b, g, be) in enumerate(block_params):
        w_p = pad_weight(w, din_p, h_p)
        vec_p = pack_vec([b, g, be], h_p)
        residual = resid_first if blk == 0 else True
        h_act, bn = block_call(h_act, din_p, bn, w_p, vec_p, residual)
        din_p = h_p

    # Final Linear (+resid), with the last block's BN affine fused in.
    wf, bf = final_params
    wf_p = pad_weight(wf, h_p, o_p)
    vecf_p = pack_vec([bf], o_p)
    limit = vmem_limit(((tb, h_p), 2), ((8, h_p), 4), ((h_p, o_p), 2),
                       ((8, o_p), 4), ((tb, o_p), 4))
    cost = pl.CostEstimate(
        flops=2 * b_p * h_p * o_p + 4 * b_p * o_p,
        transcendentals=0,
        bytes_accessed=2 * b_p * h_p + 4 * b_p * o_p + 2 * h_p * o_p)
    out_padded = pl.pallas_call(
        partial(_final_kernel, resid_last),
        grid=(n_tiles,),
        in_specs=[pl.BlockSpec((tb, h_p), lambda t: (t, 0)),
                  pl.BlockSpec((8, h_p), lambda t: (0, 0)),
                  pl.BlockSpec((h_p, o_p), lambda t: (0, 0)),
                  pl.BlockSpec((8, o_p), lambda t: (0, 0))],
        out_specs=pl.BlockSpec((tb, o_p), lambda t: (t, 0)),
        out_shape=jax.ShapeDtypeStruct((b_p, o_p), f32),
        compiler_params=pltpu.CompilerParams(
            # no cross-tile state here -> eligible for v7x megacore
            dimension_semantics=("parallel",),
            vmem_limit_bytes=limit),
        cost_estimate=cost,
    )(h_act, bn, wf_p, vecf_p)

    if b_p == B and o_p == out_dim:
        return out_padded
    return out_padded[:B, :out_dim]


def _reference_forward(x, block_params, final_params, *, in_dim, hidden_dim,
                       out_dim, nlayers, match_kernel=False):
    """Pure-JAX reference.

    match_kernel=False mirrors the PyTorch module exactly in f32.
    match_kernel=True mirrors the kernel's numerics (bf16 MXU operands, bf16
    activation storage, fused E[x^2]-mu^2 variance, scale/shift BN form) for a
    tight comparison.
    """
    eps = 1e-5

    def mm(a, w):
        if match_kernel:
            return jnp.dot(a.astype(jnp.bfloat16), w.astype(jnp.bfloat16),
                           preferred_element_type=jnp.float32)
        return jnp.dot(a, w)

    h = x.astype(jnp.float32)
    for blk, (w, b, g, be) in enumerate(block_params):
        z = mm(h, w) + b
        if blk > 0 or (in_dim == hidden_dim):
            z = z + h
        h = jnp.maximum(z, 0.0)
        if match_kernel:
            # kernel stores inter-layer activations in bf16
            h = h.astype(jnp.bfloat16).astype(jnp.float32)
        mu = jnp.mean(h, axis=0, keepdims=True)
        if match_kernel:
            var = jnp.maximum(jnp.mean(h * h, axis=0, keepdims=True) - mu * mu, 0.0)
            scale = g * jax.lax.rsqrt(var + eps)
            h = h * scale + (be - mu * scale)
        else:
            var = jnp.mean((h - mu) ** 2, axis=0, keepdims=True)
            h = (h - mu) / jnp.sqrt(var + eps) * g + be
    wf, bf = final_params
    z = mm(h, wf) + bf
    if out_dim == hidden_dim:
        z = z + h
    return z


def _make_params(key, in_dim, hidden_dim, out_dim, nlayers):
    dims = [in_dim] + [hidden_dim] * nlayers
    block_params = []
    for i in range(nlayers):
        key, k1, k2, k3, k4 = jax.random.split(key, 5)
        d_in, d_out = dims[i], dims[i + 1]
        w = jax.random.normal(k1, (d_in, d_out), jnp.float32) / np.sqrt(d_in)
        b = jax.random.uniform(k2, (d_out,), jnp.float32, -0.1, 0.1)
        g = 1.0 + 0.1 * jax.random.normal(k3, (d_out,), jnp.float32)
        be = 0.05 * jax.random.normal(k4, (d_out,), jnp.float32)
        block_params.append((w, b, g, be))
    key, k1, k2, kx = jax.random.split(key, 4)
    wf = jax.random.normal(k1, (hidden_dim, out_dim), jnp.float32) / np.sqrt(hidden_dim)
    bf = jax.random.uniform(k2, (out_dim,), jnp.float32, -0.1, 0.1)
    return block_params, (wf, bf), kx


if __name__ == "__main__":
    key = jax.random.PRNGKey(0)

    configs = [
        # (batch, in_dim, hidden_dim, out_dim, nlayers, batch_tile)
        (40, 16, 32, 16, 3, 16),   # multi-tile grid + batch padding/masking
        (24, 32, 32, 32, 2, 512),  # residual first & last layers, single tile
    ]

    for (batch, in_dim, hidden_dim, out_dim, nlayers, tb) in configs:
        key, sub = jax.random.split(key)
        block_params, final_params, kx = _make_params(sub, in_dim, hidden_dim,
                                                      out_dim, nlayers)
        x = jax.random.normal(kx, (batch, in_dim), jnp.float32)

        out = resid_linear_mlp(x, block_params, final_params, in_dim=in_dim,
                               hidden_dim=hidden_dim, out_dim=out_dim,
                               nlayers=nlayers, batch_tile=tb)
        out = jax.block_until_ready(out)
        assert out.shape == (batch, out_dim)

        # Tight check against the numerics-matched reference (same bf16 MXU /
        # storage dtypes and BN formulation as the kernel): validates structure
        # and BN statistics.
        ref_match = _reference_forward(x, block_params, final_params,
                                       in_dim=in_dim, hidden_dim=hidden_dim,
                                       out_dim=out_dim, nlayers=nlayers,
                                       match_kernel=True)
        np.testing.assert_allclose(np.asarray(out), np.asarray(ref_match),
                                   rtol=2e-3, atol=2e-3)

        # Loose sanity check against the exact PyTorch-semantics f32 reference;
        # the only difference is bf16 rounding of matmul operands/activations.
        ref_f32 = _reference_forward(x, block_params, final_params,
                                     in_dim=in_dim, hidden_dim=hidden_dim,
                                     out_dim=out_dim, nlayers=nlayers,
                                     match_kernel=False)
        np.testing.assert_allclose(np.asarray(out), np.asarray(ref_f32),
                                   rtol=1e-1, atol=1e-1)

    print("KERNEL_OK")
</pallas_src>

<mosaic_0001>
module attributes {stable_mosaic.version = 11 : i64} {
  func.func @_block_kernel(%arg0: i32, %arg1: memref<16x128xf32, #tpu.memory_space<vmem>>, %arg2: memref<128x128xbf16, #tpu.memory_space<vmem>>, %arg3: memref<8x128xf32, #tpu.memory_space<vmem>>, %arg4: memref<16x128xbf16, #tpu.memory_space<vmem>>, %arg5: memref<8x128xf32, #tpu.memory_space<vmem>>) attributes {dimension_semantics = [#tpu.dimension_semantics<arbitrary>], iteration_bounds = array<i64: 3>, scalar_prefetch = 0 : i64, scratch_operands = 0 : i64, tpu.core_type = #tpu.core_type<tc>, window_params = [{transform_indices = @transform_0, window_bounds = array<i64: 16, 128>}, {pipeline_mode = #tpu.pipeline_mode<synchronous>, transform_indices = @transform_1, window_bounds = array<i64: 128, 128>}, {pipeline_mode = #tpu.pipeline_mode<synchronous>, transform_indices = @transform_2, window_bounds = array<i64: 8, 128>}, {transform_indices = @transform_3, window_bounds = array<i64: 16, 128>}, {pipeline_mode = #tpu.pipeline_mode<synchronous>, transform_indices = @transform_4, window_bounds = array<i64: 8, 128>}]} {
    %c0 = arith.constant 0 : index
    %c0_0 = arith.constant 0 : index
    %0 = vector.load %arg1[%c0, %c0_0] : memref<16x128xf32, #tpu.memory_space<vmem>>, vector<16x128xf32>
    %1 = arith.truncf %0 : vector<16x128xf32> to vector<16x128xbf16>
    %c0_1 = arith.constant 0 : index
    %c0_2 = arith.constant 0 : index
    %2 = vector.load %arg2[%c0_1, %c0_2] : memref<128x128xbf16, #tpu.memory_space<vmem>>, vector<128x128xbf16>
    %cst = arith.constant dense<0.000000e+00> : vector<16x128xf32>
    %3 = tpu.matmul %1, %2, %cst {dimension_numbers = #tpu.dot_dimension_numbers<[1], [0], [0], [1], [0, 0, 1, 1], [], []>} : vector<16x128xbf16>, vector<128x128xbf16>, vector<16x128xf32> -> vector<16x128xf32>
    %c0_3 = arith.constant 0 : index
    %c0_4 = arith.constant 0 : index
    %4 = vector.load %arg3[%c0_3, %c0_4] : memref<8x128xf32, #tpu.memory_space<vmem>>, vector<1x128xf32>
    %5 = vector.broadcast %4 : vector<1x128xf32> to vector<16x128xf32>
    %6 = arith.addf %3, %5 : vector<16x128xf32>
    %cst_5 = arith.constant 0.000000e+00 : f32
    %7 = vector.broadcast %cst_5 : f32 to vector<16x128xf32>
    %8 = arith.maximumf %6, %7 : vector<16x128xf32>
    %9 = arith.truncf %8 : vector<16x128xf32> to vector<16x128xbf16>
    %c0_6 = arith.constant 0 : index
    %c0_7 = arith.constant 0 : index
    %10 = vector.load %arg4[%c0_6, %c0_7] : memref<16x128xbf16, #tpu.memory_space<vmem>>, vector<16x128xbf16>
    tpu.vector_store %arg4[%c0_6, %c0_7], %9 {strides = array<i32>} : memref<16x128xbf16, #tpu.memory_space<vmem>>, vector<16x128xbf16>,
    %11 = arith.extf %9 : vector<16x128xbf16> to vector<16x128xf32>
    %c16_i32 = arith.constant 16 : i32
    %12 = arith.muli %arg0, %c16_i32 : i32
    %13 = tpu.iota {dimensions = array<i32: 0>} : vector<16x1xi32>
    %14 = vector.broadcast %12 : i32 to vector<16x1xi32>
    %15 = arith.addi %14, %13 : vector<16x1xi32>
    %c40_i32 = arith.constant 40 : i32
    %16 = vector.broadcast %c40_i32 : i32 to vector<16x1xi32>
    %17 = arith.cmpi slt, %15, %16 : vector<16x1xi32>
    %cst_8 = arith.constant 0.000000e+00 : f32
    %18 = vector.shape_cast %17 : vector<16x1xi1> to vector<16x1xi1>
    %19 = vector.broadcast %18 : vector<16x1xi1> to vector<16x128xi1>
    %20 = vector.broadcast %cst_8 : f32 to vector<16x128xf32>
    %21 = arith.select %19, %11, %20 : vector<16x128xi1>, vector<16x128xf32>
    %cst_9 = arith.constant dense<0.000000e+00> : vector<128xf32>
    %22 = vector.multi_reduction <add>, %21, %cst_9 [0] : vector<16x128xf32> to vector<128xf32>
    %23 = vector.shape_cast %22 : vector<128xf32> to vector<1x128xf32>
    %24 = arith.mulf %21, %21 : vector<16x128xf32>
    %cst_10 = arith.constant dense<0.000000e+00> : vector<128xf32>
    %25 = vector.multi_reduction <add>, %24, %cst_10 [0] : vector<16x128xf32> to vector<128xf32>
    %26 = vector.shape_cast %25 : vector<128xf32> to vector<1x128xf32>
    %c0_i32 = arith.constant 0 : i32
    %27 = arith.cmpi eq, %arg0, %c0_i32 : i32
    %28 = arith.extui %27 : i1 to i32
    %c0_i32_11 = arith.constant 0 : i32
    %29 = arith.cmpi ne, %28, %c0_i32_11 : i32
    scf.if %29 {
      %cst_20 = arith.constant 0.000000e+00 : f32
      %39 = vector.broadcast %cst_20 : f32 to vector<8x128xf32>
      %c0_21 = arith.constant 0 : index
      %c0_22 = arith.constant 0 : index
      %40 = vector.load %arg5[%c0_21, %c0_22] : memref<8x128xf32, #tpu.memory_space<vmem>>, vector<8x128xf32>
      tpu.vector_store %arg5[%c0_21, %c0_22], %39 {strides = array<i32>} : memref<8x128xf32, #tpu.memory_space<vmem>>, vector<8x128xf32>,
    } else {
    }
    %c0_12 = arith.constant 0 : index
    %c0_13 = arith.constant 0 : index
    %30 = vector.load %arg5[%c0_12, %c0_13] : memref<8x128xf32, #tpu.memory_space<vmem>>, vector<1x128xf32>
    %31 = arith.addf %30, %23 : vector<1x128xf32>
    %c0_14 = arith.constant 0 : index
    %c0_15 = arith.constant 0 : index
    %32 = vector.load %arg5[%c0_14, %c0_15] : memref<8x128xf32, #tpu.memory_space<vmem>>, vector<1x128xf32>
    tpu.vector_store %arg5[%c0_14, %c0_15], %31 {strides = array<i32>} : memref<8x128xf32, #tpu.memory_space<vmem>>, vector<1x128xf32>,
    %c1 = arith.constant 1 : index
    %c0_16 = arith.constant 0 : index
    %33 = vector.load %arg5[%c1, %c0_16] : memref<8x128xf32, #tpu.memory_space<vmem>>, vector<1x128xf32>
    %34 = arith.addf %33, %26 : vector<1x128xf32>
    %c1_17 = arith.constant 1 : index
    %c0_18 = arith.constant 0 : index
    %35 = vector.load %arg5[%c1_17, %c0_18] : memref<8x128xf32, #tpu.memory_space<vmem>>, vector<1x128xf32>
    tpu.vector_store %arg5[%c1_17, %c0_18], %34 {strides = array<i32>} : memref<8x128xf32, #tpu.memory_space<vmem>>, vector<1x128xf32>,
    %c2_i32 = arith.constant 2 : i32
    %36 = arith.cmpi eq, %arg0, %c2_i32 : i32
    %37 = arith.extui %36 : i1 to i32
    %c0_i32_19 = arith.constant 0 : i32
    %38 = arith.cmpi ne, %37, %c0_i32_19 : i32
    scf.if %38 {
      %c1_20 = arith.constant 1 : index
      %c0_21 = arith.constant 0 : index
      %39 = vector.load %arg3[%c1_20, %c0_21] : memref<8x128xf32, #tpu.memory_space<vmem>>, vector<1x128xf32>
      %c2 = arith.constant 2 : index
      %c0_22 = arith.constant 0 : index
      %40 = vector.load %arg3[%c2, %c0_22] : memref<8x128xf32, #tpu.memory_space<vmem>>, vector<1x128xf32>
      %c0_23 = arith.constant 0 : index
      %c0_24 = arith.constant 0 : index
      %41 = vector.load %arg5[%c0_23, %c0_24] : memref<8x128xf32, #tpu.memory_space<vmem>>, vector<1x128xf32>
      %cst_25 = arith.constant 2.500000e-02 : f32
      %42 = vector.broadcast %cst_25 : f32 to vector<1x128xf32>
      %43 = arith.mulf %41, %42 : vector<1x128xf32>
      %c1_26 = arith.constant 1 : index
      %c0_27 = arith.constant 0 : index
      %44 = vector.load %arg5[%c1_26, %c0_27] : memref<8x128xf32, #tpu.memory_space<vmem>>, vector<1x128xf32>
      %cst_28 = arith.constant 2.500000e-02 : f32
      %45 = vector.broadcast %cst_28 : f32 to vector<1x128xf32>
      %46 = arith.mulf %44, %45 : vector<1x128xf32>
      %47 = arith.mulf %43, %43 : vector<1x128xf32>
      %48 = arith.subf %46, %47 : vector<1x128xf32>
      %cst_29 = arith.constant 0.000000e+00 : f32
      %49 = vector.broadcast %cst_29 : f32 to vector<1x128xf32>
      %50 = arith.maximumf %48, %49 : vector<1x128xf32>
      %cst_30 = arith.constant 9.99999974E-6 : f32
      %51 = vector.broadcast %cst_30 : f32 to vector<1x128xf32>
      %52 = arith.addf %50, %51 : vector<1x128xf32>
      %53 = math.rsqrt %52 : vector<1x128xf32>
      %54 = arith.mulf %39, %53 : vector<1x128xf32>
      %c0_31 = arith.constant 0 : index
      %c0_32 = arith.constant 0 : index
      %55 = vector.load %arg5[%c0_31, %c0_32] : memref<8x128xf32, #tpu.memory_space<vmem>>, vector<1x128xf32>
      tpu.vector_store %arg5[%c0_31, %c0_32], %54 {strides = array<i32>} : memref<8x128xf32, #tpu.memory_space<vmem>>, vector<1x128xf32>,
      %56 = arith.mulf %43, %54 : vector<1x128xf32>
      %57 = arith.subf %40, %56 : vector<1x128xf32>
      %c1_33 = arith.constant 1 : index
      %c0_34 = arith.constant 0 : index
      %58 = vector.load %arg5[%c1_33, %c0_34] : memref<8x128xf32, #tpu.memory_space<vmem>>, vector<1x128xf32>
      tpu.vector_store %arg5[%c1_33, %c0_34], %57 {strides = array<i32>} : memref<8x128xf32, #tpu.memory_space<vmem>>, vector<1x128xf32>,
    } else {
    }
    return
  }
  func.func @transform_0(%arg0: i32) -> (i32, i32) {
    %c0_i32 = arith.constant 0 : i32
    %c0_i32_0 = arith.constant 0 : i32
    return %arg0, %c0_i32 : i32, i32
  }
  func.func @transform_1(%arg0: i32) -> (i32, i32) {
    %c0_i32 = arith.constant 0 : i32
    %c0_i32_0 = arith.constant 0 : i32
    %c0_i32_1 = arith.constant 0 : i32
    return %c0_i32, %c0_i32_0 : i32, i32
  }
  func.func @transform_2(%arg0: i32) -> (i32, i32) {
    %c0_i32 = arith.constant 0 : i32
    %c0_i32_0 = arith.constant 0 : i32
    %c0_i32_1 = arith.constant 0 : i32
    return %c0_i32, %c0_i32_0 : i32, i32
  }
  func.func @transform_3(%arg0: i32) -> (i32, i32) {
    %c0_i32 = arith.constant 0 : i32
    %c0_i32_0 = arith.constant 0 : i32
    return %arg0, %c0_i32 : i32, i32
  }
  func.func @transform_4(%arg0: i32) -> (i32, i32) {
    %c0_i32 = arith.constant 0 : i32
    %c0_i32_0 = arith.constant 0 : i32
    %c0_i32_1 = arith.constant 0 : i32
    return %c0_i32, %c0_i32_0 : i32, i32
  }
}

</mosaic_0001>

<bundles_post_ra>
// kernel: tpu_custom_call.1
= control target key start
LH: loop header
LB: loop body
LE: loop exit
PB: predicated region body
PF: predicated region fallthrough
CT: control target
= control target key end

     0   :  { %10 = vsyncpa [#allocation3], 0  ;;  %s1085_s0 = inlined_call_operand.hbm [shape: f32[48,128], index: 0, kind: input, shape index: {}]   ;;  %s1086_s1 = inlined_call_operand.hbm [shape: bf16[128,128], index: 1, kind: input, shape index: {}]   ;;  %s1087_s2 = inlined_call_operand.hbm [shape: f32[8,128], index: 2, kind: input, shape index: {}]   ;;  %s1088_s3 = inlined_call_operand.hbm [shape: bf16[48,128], index: 3, kind: output, shape index: {0}]   ;;  %s1089_s4 = inlined_call_operand.hbm [shape: f32[8,128], index: 4, kind: output, shape index: {1}]  }
   0x1   :  { %12 = vsyncpa [#allocation3 + $0x1], 0 }
   0x2   :  { %13 = vsyncpa [#allocation6], 0 }
   0x3   :  { %14 = vsyncpa [#allocation4], 0 }
   0x4   :  { %16 = vsyncpa [#allocation4 + $0x1], 0 }
   0x5   :  { %17 = vsyncpa [#allocation10], 0  ;;  %s927_s15 = smov 0   ;;  %s929_s16 = smov 0  }
   0x6   :  { %s931_s17 = smov 0   ;;  %s933_s18 = smov 0  }
   0x7 LB: > { %s948_s19 = sadd.s32 4294967295, %s890_s18   ;;  %s544_s20 = sadd.s32 4294967294, %s890_s18   ;;  %s890_s18 = sphi %s933_s18, %s1103_s18   ;;  %s886_s17 = sphi %s931_s17, %s1102_s17   ;;  %s882_s16 = sphi %s929_s16, %s1101_s16   ;;  %s878_s15 = sphi %s927_s15, %s1100_s15  }
   0x8   : > { %p43_p0 = scmp.ne.s32.totalorder %s882_s16, %s878_s15  ;;  %p44_p1 = scmp.eq.s32.totalorder %s948_s19, 0 }
   0x9   : > { %p1090_p2 = scmp.eq.s32.totalorder %s948_s19, 2  ;;  %p115_p3 = scmp.eq.s32.totalorder %s544_s20, 2 }
   0xa   : > { %p957_p4 = por %p44_p1, %p43_p0  ;;  %p545_p5 = scmp.ge.s32.totalorder %s890_s18, 1 }
   0xb   : > { %p962_p6 = por %p115_p3, %p43_p0  ;;  %p143_p7 = scmp.lt.s32.totalorder %s890_s18, 4 }
   0xc   : > { %s154_s25 = sshll.u32 %s1086_s1, 4  ;;  %s892_s27 = smov [#allocation5]   ;;  %s155_s25 = int_to_ptr.hbm [resolvable:$true] %s154_s25 }
   0xd   : > { %p971_p9 = pnand %p545_p5, %p143_p7  ;;  %s156_s28 = sshll.u32 %s892_s27, 4  ;;  %s157_s28 = int_to_ptr.vmem [resolvable:$true] %s156_s28 }
   0xe   : > { %s169_s5 = sshll.u32 %s1087_s2, 4  ;;  %s893_s6 = smov 64   ;;  %s170_s5 = int_to_ptr.hbm [resolvable:$true] %s169_s5 }
   0xf   : > { %p630_p10 = pneg %p971_p9  ;;  %s894_s7 = smov 4  }
  0x10   : > { %s895_s8 = smov [#allocation7]   ;;  %s983_s10 = sadd.s32 1, %s890_s18  }
  0x11   : > { %p631_p11 = pnand %p630_p10, %p44_p1  ;;  %s171_s9 = sshll.u32 %s895_s8, 4  ;;  %s172_s9 = int_to_ptr.vmem [resolvable:$true] %s171_s9 }
  0x12   : > { %s30_s11 = sadd.s32 1, %s886_s17  ;;  %s27_s12 = ssub.s32 %s890_s18, %s983_s10 }
  0x13   : > { %633 = dma.hbm_to_vmem [thread:$0]  (!%p631_p11), %s155_s25, 1024, %s157_s28, [#allocation6], %s893_s6, %s893_s6, %s894_s7  }
  0x14   : > { %636 = dma.hbm_to_vmem [thread:$0]  (!%p631_p11), %s170_s5, 128, %s172_s9, [#allocation6]  }
  0x15   : > { %p37_p12 = scmp.ne.s32.totalorder %s886_s17, %s882_s16  ;;  %p28_p13 = scmp.eq.s32.totalorder %s27_s12, 0 }
  0x16   : > { %p38_p0 = scmp.eq.s32.totalorder %s890_s18, 0  ;;  %p647_p5 = scmp.lt.s32.totalorder %s890_s18, 3 }
  0x17   : > { %p993_p3 = por %p1090_p2, %p37_p12  ;;  %s182_s20 = sand.u32 1, %s886_s17  }
  0x18   : > { %s999_s14 = scalar_select %p28_p13, %s886_s17, %s30_s11  }
  0x19   : > { %p39_p7 = por %p38_p0, %p37_p12  ;;  %s549_s23 = sshll.u32 %s182_s20, 4 }
  0x1a   : > { %s599_s24 = sshll.u32 %s890_s18, 4  ;;  %s186_s29 = scalar_lea.vmem [#allocation2], %s549_s23 }
  0x1b   : > { %s191_s28 = scalar_lea.hbm %s1085_s0, %s599_s24  ;;  %s194_s30 = sshll.u32 %s186_s29, 4  ;;  %s195_s30 = int_to_ptr.vmem [resolvable:$true] %s194_s30 }
  0x1c   : > { %s192_s5 = sshll.u32 %s191_s28, 4  ;;  %p1006_p10 = pnand %p647_p5, %p39_p7  ;;  %s193_s5 = int_to_ptr.hbm [resolvable:$true] %s192_s5 }
  0x1d   : > { %s183_s7 = scalar_lea.sflag [#allocation3], %s182_s20  ;;  %s758_s8 = sshra.s32 %s193_s5, 4  ;;  %s759_s8 = int_to_ptr.hbm [resolvable:$true] %s758_s8 }
  0x1e   : > { %s760_s9 = scalar_lea.hbm %s759_s8, 16  ;;  %p762_p12 = pneg %p1006_p10 }
  0x1f   : > { %p761_p11 = scmp.ne.s32.totalorder %s759_s8, %s760_s9  ;;  %s765_s23 = scalar_lea.hbm %s1085_s0, 48 }
  0x20   : > { %p766_p5 = scmp.lt.s32.totalorder %s759_s8, %s1085_s0  ;;  %p767_p7 = scmp.lt.s32.totalorder %s765_s23, %s760_s9 }
  0x21   : > { %p763_p13 = pnand %p762_p12, %p761_p11 }
  0x22   : > { %p768_p2 = por %p767_p7, %p766_p5 }
  0x23   : > { %p764_p0 = pneg %p763_p13 }
  0x25   : > { %p769_p8 = pnand %p768_p2, %p764_p0 }
  0x27   : > { %772 = shalt.err (!%p769_p8)
}
  0x28   : > { %s896_s20 = smov 128   ;;  %s897_s27 = smov 8  }
  0x29   : > { %640 = dma.hbm_to_vmem [thread:$0]  (!%p1006_p10), %s193_s5, 256, %s195_s30, %s183_s7, %s896_s20, %s896_s20, %s897_s27  }
  0x2a   : > { %206 = sbr.rel (%p971_p9) target bundleno = 318 (0x13e), region = 32  ;;  %s1023_s28 = sand.u32 (!%p971_p9), 1, %s882_s16  }
  0x2b   : > { %s553_s29 = sshll.u32 (!%p971_p9), %s1023_s28, 4  ;;  %s209_s8 = scalar_lea.sflag (!%p971_p9), [#allocation3], %s1023_s28 }
  0x2c   : > { %s212_s9 = scalar_lea.vmem (!%p971_p9), [#allocation2], %s553_s29 }
  0x2f   : > { %861 = dma.done.wait (%p957_p4), %s209_s8, 256  }
  0x30   : > { %863 = vsyncadd (%p957_p4), %s209_s8, 4294967040 }
  0x31   : > { %865 = dma.done.wait (%p44_p1), [#allocation6], 1152  }
  0x32   : > { %867 = vsyncadd (%p44_p1), [#allocation6], 4294966144  ;;  %v607_v0 = vld [vmem:[#allocation5 + $0x38] sm:$0xff]  ;;  %v606_v1 = vld [vmem:[#allocation5 + $0x30] sm:$0xff]  ;;  %v342_v13 = vlaneseq  ;;  %s589_s21 = sshll.u32 %s948_s19, 4  ;;  %s556_s26 = sshll.u32 %s1023_s28, 3 }
  0x33   : > { %319 = vmatpush.bf16.msra.mxu0 %v607_v0  ;;  %v605_v2 = vld [vmem:[#allocation5 + $0x28] sm:$0xff]  ;;  %v604_v3 = vld [vmem:[#allocation5 + $0x20] sm:$0xff]  ;;  %v603_v4 = vld [vmem:[#allocation5 + $0x18] sm:$0xff]  ;;  %v345_v17 = vstv %s589_s21  ;;  %s1037_s30 = scalar_lea.vmem [#allocation8], %s556_s26  ;;  %p1096_p1 = scmp.ne.s32.totalorder %s948_s19, 0 }
  0x34   : > { %v602_v5 = vld [vmem:[#allocation5 + $0x10] sm:$0xff]  ;;  %v601_v6 = vld [vmem:[#allocation5 + $0x8] sm:$0xff]  ;;  %v600_v7 = vld [vmem:[#allocation5] sm:$0xff]  ;;  %v343_v16 = vshrl.u32 %v342_v13, 7 }
  0x35   : > { %v250_v8 = vld [vmem:[%s212_s9] sm:$0xff]  ;;  %v251_v9 = vld [vmem:[%s212_s9 + $0x8] sm:$0xff] }
  0x36   : > { %v252_v10 = vpack.c.bf16 %v251_v9, %v250_v8  ;;  %v695_v11 = vld [vmem:[#allocation7] ss:$0 sm:$0xff]  ;;  %v344_v18 = vadd.s32 8, %v343_v16  ;;  %v346_v20 = vadd.s32 %v345_v17, %v343_v16 }
  0x37   : > { %320 = vmatpush.bf16.msra.mxu0 %v606_v1 }
  0x38   : > { %v347_v23 = vadd.s32 %v345_v17, %v344_v18  ;;  %vm348_vm0 = vcmp.lt.s32.totalorder %v346_v20, 40 }
  0x3a   : > { %vm349_vm1 = vcmp.lt.s32.totalorder %v347_v23, 40 }
  0x3b   : > { %321 = vmatpush.bf16.msra.mxu0 %v605_v2 }
  0x3f   : > { %322 = vmatpush.bf16.msra.mxu0 %v604_v3 }
  0x43   : > { %323 = vmatpush.bf16.msra.mxu0 %v603_v4 }
  0x47   : > { %324 = vmatpush.bf16.msra.mxu0 %v602_v5 }
  0x4b   : > { %325 = vmatpush.bf16.msra.mxu0 %v601_v6 }
  0x4f   : > { %326 = vmatpush.bf16.msra.mxu0 %v600_v7 }
  0x52   : > { %327 = vmatmul.bf16.vlgmr.msra.gmra.mxu0 %v252_v10 }
  0xcf   : > { %v328_v12 = vpop.f32.mrf.mxu0 }
  0xd0   : > { %v329_v14 = vadd.f32 %v695_v11, %v328_v12 }
  0xd2   : > { %v333_v15 = vmax.f32 %v329_v14, 0.0 }
  0xd4   : > { %v335_v19 = vpack.c.bf16 %v333_v15, %v333_v15 }
  0xd6   : > { %v339_v24 = vunpack.c.l.bf16 %v335_v19 }
  0xd7   : > { %v330_v21 = vpop.f32.mrf.mxu0 }
  0xd8   : > { %v331_v22 = vadd.f32 %v695_v11, %v330_v21  ;;  %v354_v28 = vsel %vm348_vm0, %v339_v24, 0.0 }
  0xd9   : > { %v363_v31 = vmul.f32 %v354_v28, %v354_v28 }
  0xda   : > { %v334_v25 = vmax.f32 %v331_v22, 0.0 }
  0xdc   : > { %v336_v26 = vpack.c.bf16 %v334_v25, %v334_v25  ;;  %v612_v27 = vpack.c.bf16 %v334_v25, %v333_v15 }
  0xde   : > { %613 = vst [vmem:[%s1037_s30] sm:$0xff] %v612_v27   ;;  %v340_v29 = vunpack.c.l.bf16 %v336_v26 }
  0xe0   : > { %v355_v30 = vsel %vm349_vm1, %v340_v29, 0.0 }
  0xe1   : > { %v356_v32 = vadd.f32 %v355_v30, %v354_v28  ;;  %v364_v33 = vmul.f32 %v355_v30, %v355_v30 }
  0xe3   : > { %v357_v34 = vrot.slane %v356_v32, 4  ;;  %v365_v35 = vadd.f32 %v364_v33, %v363_v31 }
  0xe5   : > { %v358_v36 = vadd.f32 %v357_v34, %v356_v32  ;;  %v366_v37 = vrot.slane %v365_v35, 4 }
  0xe7   : > { %v359_v38 = vrot.slane %v358_v36, 2  ;;  %v367_v39 = vadd.f32 %v366_v37, %v365_v35 }
  0xe9   : > { %v360_v40 = vadd.f32 %v359_v38, %v358_v36  ;;  %v368_v41 = vrot.slane %v367_v39, 2 }
  0xeb   : > { %v361_v42 = vrot.slane %v360_v40, 1  ;;  %v369_v43 = vadd.f32 %v368_v41, %v367_v39  ;;  %375 = sbr.rel (%p1096_p1) target bundleno = 242 (0xf2), region = 48 }
  0xed   : > { %v362_v44 = vadd.f32 %v361_v42, %v360_v40  ;;  %v370_v45 = vrot.slane %v369_v43, 1 }
  0xef   : > { %v371_v46 = vadd.f32 %v370_v45, %v369_v43 }
  0xf0   : > { %v898_v47 = vmov 0.0  }
  0xf1   : > { %376 = vst [vmem:[#allocation9] sm:$0xff] %v898_v47 }
  0xf2 PF: > { %p591_p2 = scmp.ne.s32.totalorder %s948_s19, 2 }
  0xf8   : > { %v377_v48 = vld [vmem:[#allocation9] sm:$0x1]  ;;  %v380_v49 = vld [vmem:[#allocation9 + $0x1] sm:$0x1]  ;;  %386 = sbr.rel (%p591_p2) target bundleno = 294 (0x126), region = 52 }
  0xf9   : > { %v378_v50 = vadd.f32 %v377_v48, %v362_v44  ;;  %v381_v51 = vadd.f32 %v380_v49, %v371_v46 }
  0xfb   : > { %379 = vst [vmem:[#allocation9] sm:$0x1] %v378_v50 }
  0xfc   : > { %382 = vst [vmem:[#allocation9 + $0x1] sm:$0x1] %v381_v51 }
  0xfd   : > { %v387_v1 = vld [vmem:[#allocation7 + $0x1] sm:$0x1]  ;;  %v388_v5 = vld [vmem:[#allocation7 + $0x2] sm:$0x1] }
 0x102   : > { %v389_v52 = vld [vmem:[#allocation9] sm:$0x1] }
 0x103   : > { %v391_v53 = vld [vmem:[#allocation9 + $0x1] sm:$0x1]  ;;  %v390_v54 = vmul.f32 0.025, %v389_v52 }
 0x104   : > { %v392_v55 = vmul.f32 0.025, %v391_v53 }
 0x105   : > { %v393_v56 = vmul.f32 %v390_v54, %v390_v54 }
 0x107   : > { %v394_v57 = vsub.f32 %v392_v55, %v393_v56 }
 0x109   : > { %v395_v58 = vmax.f32 %v394_v57, 0.0 }
 0x10b   : > { %v396_v59 = vadd.f32 1e-05, %v395_v58 }
 0x10d   : > { %696 = vrsqrt.f32 %v396_v59  ;;  %vm403_vm2 = vweird.f32 %v396_v59 }
 0x113   : > { %v697_v60 = vpop.eup %696 }
 0x114   : > { %v398_v61 = vmul.f32 %v697_v60, %v396_v59  ;;  %vm404_vm3 = vweird.f32 %v697_v60 }
 0x115   : > { %vm405_vm4 = vmor %vm403_vm2, %vm404_vm3 }
 0x116   : > { %v399_v62 = vmul.f32 %v697_v60, %v398_v61 }
 0x118   : > { %v400_v63 = vmul.f32 0.5, %v399_v62 }
 0x11a   : > { %v401_v0 = vsub.f32 1.5, %v400_v63 }
 0x11c   : > { %v402_v2 = vmul.f32 %v697_v60, %v401_v0 }
 0x11e   : > { %v406_v3 = vsel %vm405_vm4, %v697_v60, %v402_v2 }
 0x11f   : > { %v407_v4 = vmul.f32 %v406_v3, %v387_v1 }
 0x121   : > { %408 = vst [vmem:[#allocation9] sm:$0x1] %v407_v4  ;;  %v409_v6 = vmul.f32 %v407_v4, %v390_v54 }
 0x123   : > { %v410_v7 = vsub.f32 %v388_v5, %v409_v6 }
 0x125   : > { %411 = vst [vmem:[#allocation9 + $0x1] sm:$0x1] %v410_v7 }
 0x126 PF: > { %s608_s5 = sshll.u32 %s948_s19, 3  ;;  %s425_s12 = sshll.u32 %s1037_s30, 4  ;;  %s426_s12 = int_to_ptr.vmem [resolvable:$true] %s425_s12 }
 0x127   : > { %s424_s11 = scalar_lea.hbm %s1088_s3, %s608_s5  ;;  %s413_s24 = scalar_lea.sflag [#allocation4], %s1023_s28 }
 0x128   : > { %s427_s23 = sshll.u32 %s424_s11, 4  ;;  %s808_s8 = scalar_lea.hbm %s1088_s3, 24  ;;  %s428_s23 = int_to_ptr.hbm [resolvable:$true] %s427_s23 }
 0x129   : > { %s802_s25 = sshra.s32 %s428_s23, 4  ;;  %s803_s25 = int_to_ptr.hbm [resolvable:$true] %s802_s25 }
 0x12a   : > { %s804_s20 = scalar_lea.hbm %s803_s25, 8  ;;  %p809_p10 = scmp.lt.s32.totalorder %s803_s25, %s1088_s3 }
 0x12b   : > { %p805_p4 = scmp.ne.s32.totalorder %s803_s25, %s804_s20  ;;  %p810_p11 = scmp.lt.s32.totalorder %s808_s8, %s804_s20 }
 0x12d   : > { %p806_p8 = pnand %p805_p4, %p993_p3  ;;  %p811_p12 = por %p810_p11, %p809_p10 }
 0x12f   : > { %p807_p9 = pneg %p806_p8 }
 0x131   : > { %p812_p13 = pnand %p811_p12, %p807_p9 }
 0x133   : > { %815 = shalt.err (!%p812_p13)
}
 0x134   : > { %s899_s28 = smov 64   ;;  %s900_s26 = smov 4  }
 0x135   : > { %624 = dma.vmem_to_hbm [thread:$0]  (%p993_p3), %s426_s12, 128, %s428_s23, %s413_s24, %s899_s28, %s899_s28, %s900_s26  }
 0x136   : > { %s901_s30 = smov [#allocation9]   ;;  %s442_s11 = sshll.u32 %s1089_s4, 4  ;;  %s443_s11 = int_to_ptr.hbm [resolvable:$true] %s442_s11 }
 0x137   : > { %s440_s5 = sshll.u32 %s901_s30, 4  ;;  %p1097_p0 = scmp.eq.s32.totalorder %s948_s19, 2  ;;  %s441_s5 = int_to_ptr.vmem [resolvable:$true] %s440_s5 }
 0x139   : > { %626 = dma.vmem_to_hbm [thread:$0]  (%p1097_p0), %s441_s5, 128, %s443_s11, [#allocation10]  }
 0x13a   : > { %p1098_p5 = pmov %p1097_p0 }
 0x13b   : > { %p1099_p7 = pmov %p1097_p0 }
 0x13c   : > { %869 = dma.done.wait (%p1098_p5), [#allocation10], 128  }
 0x13d   : > { %871 = vsyncadd (%p1099_p7), [#allocation10], 4294967168 }
 0x13e PF: > { %p652_p3 = scmp.ge.s32.totalorder %s890_s18, 2  ;;  %s459_s13 = sand.u32 1, %s878_s15  }
 0x13f   : > { %s460_s12 = scalar_lea.sflag [#allocation4], %s459_s13 }
 0x140   : > { %p642_p1 = pnand %p652_p3, %p962_p6 }
 0x142   : > { %p643_p2 = pneg %p642_p1 }
 0x144   : > { %873 = dma.done.wait (%p643_p2), %s460_s12, 128  }
 0x145   : > { %875 = vsyncadd (%p643_p2), %s460_s12, 4294967168  ;;  %p20_p4 = scmp.ge.s32.totalorder %s983_s10, 5   ;;  %s1100_s15 = smov %s882_s16 }
 0x146   : > { %s1101_s16 = smov %s886_s17  ;;  %s1102_s17 = smov %s999_s14 }
 0x147   : > { %s1103_s18 = smov %s983_s10  ;;  %22 = sbr.rel (!%p20_p4) target bundleno = 7 (0x7), region = 101 }
 0x14c   :  { %466 = vsyncpa [#allocation3], 1 }
 0x14d   :  { %468 = vsyncpa [#allocation3 + $0x1], 1 }
 0x14e   :  { %469 = vsyncpa [#allocation6], 1 }
 0x14f   :  { %470 = vsyncpa [#allocation4], 1 }
 0x150   :  { %472 = vsyncpa [#allocation4 + $0x1], 1 }
 0x151   :  { %473 = vsyncpa [#allocation10], 1 }

</bundles_post_ra>
